<compile_context>
chip_gen: v6e
topology: v6e:2x2x1
jax: 0.10.0
libtpu: 0.0.40
codegen_flags: <defaults>
</compile_context>

<pallas_src>
import jax
import jax.numpy as jnp
from jax import lax
from jax.experimental import pallas as pl
from jax.experimental.pallas import tpu as pltpu


def _round_up(a: int, b: int) -> int:
    return (a + b - 1) // b * b


def _stat_constants(HW: int, eps: float):
    inv_hw = 1.0 / HW
    # torch.var default is unbiased (divide by HW - 1).
    inv_hwm1 = (1.0 / (HW - 1)) if HW > 1 else float("inf")
    return inv_hw, inv_hwm1, float(eps)


def _finalize(s, ssq, inv_hw, inv_hwm1, eps_f, o_ref):
    mean = s * inv_hw
    # One-pass variance; clamp cancellation error so sqrt never sees < 0.
    var = jnp.maximum(ssq - s * mean, 0.0) * inv_hwm1
    std = jnp.sqrt(var + eps_f)
    # Lane-dense stores: full rows of the (2, row_tile) output block.
    o_ref[0, :] = mean[:, 0].astype(o_ref.dtype)
    o_ref[1, :] = std[:, 0].astype(o_ref.dtype)


def _make_single_block_kernel(HW: int, eps: float):
    """Full spatial extent fits in one block: one-pass mean/var per row tile."""
    inv_hw, inv_hwm1, eps_f = _stat_constants(HW, eps)

    def kernel(x_ref, o_ref):
        x = x_ref[...].astype(jnp.float32)                    # (row_tile, HW)
        s = jnp.sum(x, axis=-1, keepdims=True)
        ssq = jnp.sum(x * x, axis=-1, keepdims=True)
        _finalize(s, ssq, inv_hw, inv_hwm1, eps_f, o_ref)

    return kernel


def _make_accum_kernel(HW: int, hw_tile: int, eps: float):
    """Spatially tiled path: f32 sum / sum-of-squares accumulators in VMEM."""
    inv_hw, inv_hwm1, eps_f = _stat_constants(HW, eps)
    rem = HW % hw_tile  # static; nonzero => last spatial block is ragged

    def kernel(x_ref, o_ref, sum_ref, ssq_ref):
        k = pl.program_id(1)
        last = pl.num_programs(1) - 1

        @pl.when(k == 0)
        def _():
            sum_ref[...] = jnp.zeros_like(sum_ref)
            ssq_ref[...] = jnp.zeros_like(ssq_ref)

        x = x_ref[...].astype(jnp.float32)                    # (row_tile, hw_tile)
        if rem != 0:
            # In-kernel masking of the ragged last spatial block (replaces the
            # old jnp.pad HBM round-trip); a few VPU ops fully hidden under DMA.
            lane = lax.broadcasted_iota(jnp.int32, x.shape, 1)
            limit = jnp.where(k == last, rem, hw_tile)
            x = jnp.where(lane < limit, x, 0.0)

        sum_ref[...] += jnp.sum(x, axis=-1, keepdims=True)
        ssq_ref[...] += jnp.sum(x * x, axis=-1, keepdims=True)

        @pl.when(k == last)
        def _():
            _finalize(sum_ref[...], ssq_ref[...], inv_hw, inv_hwm1, eps_f, o_ref)

    return kernel


def _default_block_bytes() -> int:
    """Per-generation block cap: v5e stays modest, v6e/v7x get bigger blocks."""
    try:
        kind = jax.devices()[0].device_kind.lower()
    except Exception:
        return 8 * 1024 * 1024
    if "v5" in kind and ("lite" in kind or "v5e" in kind):
        return 4 * 1024 * 1024
    return 8 * 1024 * 1024


def _maybe_buffered_spec(block_shape, index_map, buffers: int) -> pl.BlockSpec:
    if buffers > 2:
        try:
            return pl.BlockSpec(block_shape, index_map,
                                pipeline_mode=pl.Buffered(buffers))
        except (TypeError, AttributeError):
            pass
    return pl.BlockSpec(block_shape, index_map)


def style_pool(x: jax.Array, eps: float = 1e-5, *,
               max_block_bytes: int | None = None) -> jax.Array:
    """Pallas implementation of Style_Pool.forward. x: (N, C, H, W) -> (N, 2C, 1)."""
    N, C, H, W = x.shape
    HW = H * W
    R = N * C
    if max_block_bytes is None:
        max_block_bytes = _default_block_bytes()

    itemsize = jnp.dtype(x.dtype).itemsize
    out_dtype = x.dtype
    out_itemsize = jnp.dtype(out_dtype).itemsize

    xr = x.reshape(R, HW)

    # ---- tile selection ----
    # Dtype sublane packing: 8 rows (f32) / 16 (bf16) / 32 (int8, fp8).
    sub = max(8, 32 // itemsize)
    # When the row count must be over-read, round to the dtype's sublane
    # multiple; when R is already 8-aligned, an exact (full-dim) block is fine.
    R_aligned = R if R % 8 == 0 else _round_up(R, sub)

    # Block budget counted in f32 elements so in-kernel f32 temps (upcast,
    # x*x) are bounded the same way regardless of the input dtype.
    budget_elems = max(max_block_bytes // 4, 8 * 128)

    if R < 256 and R_aligned * HW <= budget_elems:
        # Single block covers everything (too few rows to form two lane-legal
        # >=128-row tiles anyway).
        row_tile, hw_tile = R_aligned, HW
    elif 128 * HW <= budget_elems:
        # Full spatial extent per block; rows tiled in multiples of 128.
        row_tile = (budget_elems // HW) // 128 * 128
        row_tile = min(row_tile, _round_up(R, 128))
        if R >= 256:
            # Keep >= 2 row tiles so the "parallel" row axis can shard across
            # TensorCores (v7x megacore); essentially free elsewhere.
            row_tile = min(row_tile, _round_up(-(-R // 2), 128))
        row_tile = max(row_tile, 128)
        hw_tile = HW
    else:
        # Spatial tiling required: bounds VMEM independent of H*W.
        row_tile = R_aligned if R <= 256 else 256
        hw_tile = max(128, (budget_elems // row_tile) // 128 * 128)
        hw_tile = min(hw_tile, _round_up(HW, 128))

    grid_k = -(-HW // hw_tile)
    if grid_k == 1:
        hw_tile = HW
    grid_r = -(-R // row_tile)
    R_out = grid_r * row_tile

    # ---- VMEM accounting -> explicit vmem_limit_bytes ----
    block_elems = row_tile * hw_tile
    block_in_bytes = block_elems * itemsize
    n_bufs = 2
    if grid_k > 1 and block_in_bytes <= (2 << 20):
        n_bufs = 3  # deeper DMA queue when per-block work is tiny
    vmem_limit = (n_bufs * block_in_bytes          # pipelined input buffers
                  + 3 * block_elems * 4            # f32 upcast / x*x / mask temps
                  + 2 * 2 * row_tile * out_itemsize  # output blocks
                  + 2 * row_tile * 4               # sum / ssq accumulators
                  + (2 << 20))                     # headroom
    vmem_limit = int(max(vmem_limit, 16 << 20))

    cost = pl.CostEstimate(
        flops=3 * R * HW,
        transcendentals=R,
        bytes_accessed=R * HW * itemsize + 2 * R_out * out_itemsize,
    )

    out_shape = jax.ShapeDtypeStruct((2, R_out), out_dtype)

    if grid_k == 1:
        out = pl.pallas_call(
            _make_single_block_kernel(HW, eps),
            out_shape=out_shape,
            grid_spec=pltpu.PrefetchScalarGridSpec(
                num_scalar_prefetch=0,
                grid=(grid_r,),
                in_specs=[pl.BlockSpec((row_tile, hw_tile), lambda r: (r, 0))],
                out_specs=pl.BlockSpec((2, row_tile), lambda r: (0, r)),
            ),
            compiler_params=pltpu.CompilerParams(
                dimension_semantics=("parallel",),
                vmem_limit_bytes=vmem_limit,
            ),
            cost_estimate=cost,
        )(xr)
    else:
        out = pl.pallas_call(
            _make_accum_kernel(HW, hw_tile, eps),
            out_shape=out_shape,
            grid_spec=pltpu.PrefetchScalarGridSpec(
                num_scalar_prefetch=0,
                grid=(grid_r, grid_k),
                in_specs=[_maybe_buffered_spec((row_tile, hw_tile),
                                               lambda r, k: (r, k), n_bufs)],
                out_specs=pl.BlockSpec((2, row_tile), lambda r, k: (0, r)),
                scratch_shapes=[
                    pltpu.VMEM((row_tile, 1), jnp.float32),  # running sum
                    pltpu.VMEM((row_tile, 1), jnp.float32),  # running sum of sq.
                ],
            ),
            compiler_params=pltpu.CompilerParams(
                dimension_semantics=("parallel", "arbitrary"),
                vmem_limit_bytes=vmem_limit,
            ),
            cost_estimate=cost,
        )(xr)

    # Cheap layout plumbing back to the PyTorch output shape (N, 2C, 1).
    mean = out[0, :R].reshape(N, C, 1)
    std = out[1, :R].reshape(N, C, 1)
    return jnp.concatenate([mean, std], axis=1)


def _reference(x: jax.Array, eps: float = 1e-5) -> jax.Array:
    N, C, H, W = x.shape
    xf = x.reshape(N, C, -1).astype(jnp.float32)
    avg = jnp.mean(xf, axis=2, keepdims=True)
    var = jnp.var(xf, axis=2, keepdims=True, ddof=1) + eps
    std = jnp.sqrt(var)
    return jnp.concatenate((avg, std), axis=1).astype(x.dtype)


if __name__ == "__main__":
    key = jax.random.PRNGKey(0)
    k0, k1, k2, k3 = jax.random.split(key, 4)

    # 1) Single-block (one-pass) path.
    x = jax.random.normal(k0, (2, 4, 16, 16), dtype=jnp.float32)
    out = style_pool(x)
    jax.block_until_ready(out)
    ref = _reference(x)
    assert out.shape == (2, 8, 1), out.shape
    assert jnp.allclose(out, ref, atol=1e-4, rtol=1e-4), (
        float(jnp.max(jnp.abs(out - ref))))

    # 2) Spatially-tiled accumulator path (tiny VMEM budget), evenly divisible HW.
    x2 = jax.random.normal(k1, (2, 4, 16, 32), dtype=jnp.float32)
    out2 = style_pool(x2, max_block_bytes=8 * 1024)
    jax.block_until_ready(out2)
    ref2 = _reference(x2)
    assert out2.shape == (2, 8, 1), out2.shape
    assert jnp.allclose(out2, ref2, atol=1e-4, rtol=1e-4), (
        float(jnp.max(jnp.abs(out2 - ref2))))

    # 3) Ragged last spatial block -> in-kernel masking (no jnp.pad copy).
    x3 = jax.random.normal(k2, (2, 4, 16, 36), dtype=jnp.float32)
    out3 = style_pool(x3, max_block_bytes=8 * 1024)
    jax.block_until_ready(out3)
    ref3 = _reference(x3)
    assert out3.shape == (2, 8, 1), out3.shape
    assert jnp.allclose(out3, ref3, atol=1e-4, rtol=1e-4), (
        float(jnp.max(jnp.abs(out3 - ref3))))

    # 4) Multi-row-tile path (>= 2 row tiles for megacore) with bf16 input;
    #    bf16 stays bf16 on the wire, f32 accumulation inside.
    x4 = jax.random.normal(k3, (2, 256, 8, 8), dtype=jnp.bfloat16)
    out4 = style_pool(x4)
    jax.block_until_ready(out4)
    ref4 = _reference(x4)
    assert out4.shape == (2, 512, 1), out4.shape
    assert out4.dtype == jnp.bfloat16, out4.dtype
    assert jnp.allclose(out4.astype(jnp.float32), ref4.astype(jnp.float32),
                        atol=2e-2, rtol=2e-2)

    print("KERNEL_OK")
</pallas_src>

<mosaic_0001>
module attributes {stable_mosaic.version = 11 : i64} {
  func.func @kernel(%arg0: i32, %arg1: memref<8x256xf32, #tpu.memory_space<vmem>>, %arg2: memref<2x8xf32, #tpu.memory_space<vmem>>) attributes {dimension_semantics = [#tpu.dimension_semantics<parallel>], iteration_bounds = array<i64: 1>, scalar_prefetch = 0 : i64, scratch_operands = 0 : i64, tpu.core_type = #tpu.core_type<tc>, window_params = [{transform_indices = @transform_0, window_bounds = array<i64: 8, 256>}, {transform_indices = @transform_1, window_bounds = array<i64: 2, 8>}]} {
    %c0 = arith.constant 0 : index
    %c0_0 = arith.constant 0 : index
    %0 = vector.load %arg1[%c0, %c0_0] : memref<8x256xf32, #tpu.memory_space<vmem>>, vector<8x256xf32>
    %cst = arith.constant dense<0.000000e+00> : vector<8xf32>
    %1 = vector.multi_reduction <add>, %0, %cst [1] : vector<8x256xf32> to vector<8xf32>
    %2 = vector.shape_cast %1 : vector<8xf32> to vector<8x1xf32>
    %3 = arith.mulf %0, %0 : vector<8x256xf32>
    %cst_1 = arith.constant dense<0.000000e+00> : vector<8xf32>
    %4 = vector.multi_reduction <add>, %3, %cst_1 [1] : vector<8x256xf32> to vector<8xf32>
    %5 = vector.shape_cast %4 : vector<8xf32> to vector<8x1xf32>
    %cst_2 = arith.constant 3.906250e-03 : f32
    %6 = vector.broadcast %cst_2 : f32 to vector<8x1xf32>
    %7 = arith.mulf %2, %6 : vector<8x1xf32>
    %8 = arith.mulf %2, %7 : vector<8x1xf32>
    %9 = arith.subf %5, %8 : vector<8x1xf32>
    %cst_3 = arith.constant 0.000000e+00 : f32
    %10 = vector.broadcast %cst_3 : f32 to vector<8x1xf32>
    %11 = arith.maximumf %9, %10 : vector<8x1xf32>
    %cst_4 = arith.constant 0.00392156886 : f32
    %12 = vector.broadcast %cst_4 : f32 to vector<8x1xf32>
    %13 = arith.mulf %11, %12 : vector<8x1xf32>
    %cst_5 = arith.constant 9.99999974E-6 : f32
    %14 = vector.broadcast %cst_5 : f32 to vector<8x1xf32>
    %15 = arith.addf %13, %14 : vector<8x1xf32>
    %16 = math.sqrt %15 : vector<8x1xf32>
    %17 = vector.shape_cast %7 : vector<8x1xf32> to vector<8xf32>
    %c0_6 = arith.constant 0 : index
    %c0_7 = arith.constant 0 : index
    %18 = vector.load %arg2[%c0_6, %c0_7] : memref<2x8xf32, #tpu.memory_space<vmem>>, vector<1x8xf32>
    %19 = vector.shape_cast %18 : vector<1x8xf32> to vector<8xf32>
    %20 = vector.shape_cast %17 : vector<8xf32> to vector<1x8xf32>
    tpu.vector_store %arg2[%c0_6, %c0_7], %20 {strides = array<i32>} : memref<2x8xf32, #tpu.memory_space<vmem>>, vector<1x8xf32>,
    %21 = vector.shape_cast %16 : vector<8x1xf32> to vector<8xf32>
    %c1 = arith.constant 1 : index
    %c0_8 = arith.constant 0 : index
    %22 = vector.load %arg2[%c1, %c0_8] : memref<2x8xf32, #tpu.memory_space<vmem>>, vector<1x8xf32>
    %23 = vector.shape_cast %22 : vector<1x8xf32> to vector<8xf32>
    %24 = vector.shape_cast %21 : vector<8xf32> to vector<1x8xf32>
    tpu.vector_store %arg2[%c1, %c0_8], %24 {strides = array<i32>} : memref<2x8xf32, #tpu.memory_space<vmem>>, vector<1x8xf32>,
    return
  }
  func.func @transform_0(%arg0: i32) -> (i32, i32) {
    %c0_i32 = arith.constant 0 : i32
    %c0_i32_0 = arith.constant 0 : i32
    return %arg0, %c0_i32 : i32, i32
  }
  func.func @transform_1(%arg0: i32) -> (i32, i32) {
    %c0_i32 = arith.constant 0 : i32
    %c0_i32_0 = arith.constant 0 : i32
    return %c0_i32, %arg0 : i32, i32
  }
}

</mosaic_0001>

<bundles_post_ra>
// kernel: tpu_custom_call.1
= control target key start
LH: loop header
LB: loop body
LE: loop exit
PB: predicated region body
PF: predicated region fallthrough
CT: control target
= control target key end

     0   :  { %6 = vsyncpa [#allocation3], 0  ;;  %s144_s0 = inlined_call_operand.hbm [shape: f32[8,256], index: 0, kind: input, shape index: {}]   ;;  %s145_s1 = inlined_call_operand.hbm [shape: f32[2,8], index: 1, kind: output, shape index: {}]  }
   0x1   :  { %7 = vsyncpa [#allocation4], 0  ;;  %s124_s6 = smov [#allocation2]  }
   0x2   :  { %s14_s7 = sshll.u32 %s124_s6, 4  ;;  %s15_s7 = int_to_ptr.vmem [resolvable:$true] %s14_s7 }
   0x3   :  { %s88_s8 = scalar_lea.vmem %s15_s7, 256  ;;  %p93_p1 = scmp.lt.s32.totalorder %s15_s7, %s15_s7 }
   0x4   :  { %p89_p0 = scmp.ne.s32.totalorder %s15_s7, %s88_s8  ;;  %p94_p2 = scmp.lt.s32.totalorder %s88_s8, %s88_s8 }
   0x6   :  { %p95_p3 = por %p94_p2, %p93_p1 }
   0x8   :  { %p96_p4 = pnand %p95_p3, %p89_p0 }
   0xa   :  { %99 = shalt.err (!%p96_p4)
}
   0xb   :  { %17 = dma.hbm_to_vmem [thread:$0]  %s144_s0, 256, %s15_s7, [#allocation3]  }
   0xc   :  { %120 = dma.done.wait [#allocation3], 256  }
   0xd   :  { %121 = vsyncadd [#allocation3], 4294967040  ;;  %v21_v0 = vld [vmem:[#allocation2] sm:$0xff]  ;;  %v22_v1 = vld [vmem:[#allocation2 + $0x8] sm:$0xff]  ;;  %v45_v6 = vlaneseq  ;;  %vm52_vm0 = vcmask 57344   ;;  %s125_s0 = smov [#allocation5]  }
   0xe   :  { %v23_v2 = vadd.f32 %v22_v1, %v21_v0  ;;  %v26_v3 = vmul.f32 %v21_v0, %v21_v0  ;;  %v27_v4 = vmul.f32 %v22_v1, %v22_v1  ;;  %s67_s11 = sshll.u32 %s125_s0, 4  ;;  %s68_s11 = int_to_ptr.vmem [resolvable:$true] %s67_s11 }
   0xf   :  { %v46_v7 = vand.u32 127, %v45_v6  ;;  %v48_v8 = vshrl.u32 %v45_v6, 7  ;;  %s100_s12 = scalar_lea.vmem %s68_s11, 32  ;;  %p105_p6 = scmp.lt.s32.totalorder %s68_s11, %s68_s11 }
  0x10   :  { %24 = vadd.xlane.f32.xlu0 %v23_v2  ;;  %v28_v5 = vadd.f32 %v27_v4, %v26_v3  ;;  %p101_p5 = scmp.ne.s32.totalorder %s68_s11, %s100_s12  ;;  %p106_p7 = scmp.lt.s32.totalorder %s100_s12, %s100_s12 }
  0x11   :  { %v49_v9 = vsub.s32 %v46_v7, %v48_v8 }
  0x12   :  { %p107_p8 = por %p106_p7, %p105_p6 }
  0x14   :  { %29 = vadd.xlane.f32.xlu0 %v28_v5  ;;  %p108_p9 = pnand %p107_p8, %p101_p5 }
  0x99   :  { %v25_v10 = vpop.xlane.xlu0 %24 }
  0x9a   :  { %v31_v11 = vmul.f32 0.00390625, %v25_v10 }
  0x9c   :  { %v32_v12 = vmul.f32 %v31_v11, %v25_v10  ;;  %v50_v13 = vrot.slane %v31_v11, %v49_v9 }
  0x9d   :  { %v30_v14 = vpop.xlane.xlu0 %29 }
  0x9e   :  { %v33_v15 = vsub.f32 %v30_v14, %v32_v12  ;;  %53 = vst.msk [vmem:[#allocation5] sm:$0x1] %vm52_vm0, %v50_v13 }
  0xa0   :  { %v34_v16 = vmax.f32 %v33_v15, 0.0 }
  0xa2   :  { %v35_v17 = vmul.f32 0.003921569, %v34_v16 }
  0xa4   :  { %v36_v18 = vadd.f32 1e-05, %v35_v17 }
  0xa6   :  { %78 = vrsqrt.f32 %v36_v18  ;;  %vm39_vm1 = vcmp.eq.f32.partialorder %v36_v18, inf  ;;  %v42_v21 = vand.u32 2147483648, %v36_v18  ;;  %vm41_vm2 = vcmp.eq.f32.partialorder %v36_v18, 0.0 }
  0xb3   :  { %v79_v19 = vpop.eup %78 }
  0xb4   :  { %v38_v20 = vmul.f32 %v79_v19, %v36_v18 }
  0xb6   :  { %v40_v22 = vsel %vm39_vm1, %v36_v18, %v38_v20 }
  0xb7   :  { %v43_v23 = vsel %vm41_vm2, %v42_v21, %v40_v22 }
  0xb8   :  { %v58_v24 = vrot.slane %v43_v23, %v49_v9 }
  0xba   :  { %60 = vst.msk [vmem:[#allocation5 + $0x1] sm:$0x1] %vm52_vm0, %v58_v24 }
  0xbb   :  { %111 = shalt.err (!%p108_p9)
}
  0xbc   :  { %70 = dma.vmem_to_hbm [thread:$0]  %s68_s11, 32, %s145_s1, [#allocation4]  }
  0xbd   :  { %122 = dma.done.wait [#allocation4], 32  }
  0xbe   :  { %123 = vsyncadd [#allocation4], 4294967264 }
  0xbf   :  { %74 = vsyncpa [#allocation3], 1 }
  0xc0   :  { %75 = vsyncpa [#allocation4], 1 }

</bundles_post_ra>
